<compile_context>
chip_gen: v5e
topology: v5e:2x2
jax: 0.10.0
libtpu: 0.0.40
codegen_flags: <defaults>
</compile_context>

<pallas_src>
import functools

import jax
import jax.numpy as jnp
from jax.experimental import pallas as pl
from jax.experimental.pallas import tpu as pltpu


def _vae_loss_kernel(y_ref, rx_ref, x_ref, yp_ref, mu_ref, lv_ref,
                     out_ref, acc_ref, *, k1, k2, n_elems):
    t = pl.program_id(0)

    # ---- init accumulator ------------------------------------------------
    @pl.when(t == 0)
    def _init():
        acc_ref[...] = jnp.zeros_like(acc_ref)

    # ---- hot loop: per-lane partial sums of squared error (pure VPU) -----
    d = rx_ref[...].astype(jnp.float32) - x_ref[...].astype(jnp.float32)
    acc_ref[...] += d * d

    # ---- epilogue: cross-lane reduce + tiny KLD/NLL terms, once ----------
    @pl.when(t == pl.num_programs(0) - 1)
    def _finalize():
        # MSE over the true (un-padded) element count.
        mse = jnp.sum(acc_ref[...]) * jnp.float32(1.0 / n_elems)

        mu = mu_ref[...].astype(jnp.float32)
        lv = lv_ref[...].astype(jnp.float32)
        kld = (jnp.mean(mu * mu) + jnp.mean(jnp.exp(lv))
               - jnp.mean(lv) - 1.0)

        # NLL = -mean_i y_pred[i, y[i]]  (y is a scalar-prefetch SMEM ref).
        yp = yp_ref[...].astype(jnp.float32)          # (N, C) log-probs
        n, c = yp.shape
        cls = jax.lax.broadcasted_iota(jnp.int32, (1, c), 1)
        picked = jnp.float32(0.0)
        for i in range(n):                            # static, small batch
            label = y_ref[i]                          # SMEM scalar read
            picked = picked + jnp.sum(
                jnp.where(cls == label, yp[i, :], 0.0))
        nll = -picked * jnp.float32(1.0 / n)

        out_ref[0, 0] = nll + k1 * mse + k2 * kld


def _choose_tiling(total_elems, tile_rows=None):
    """Lane-dense reshape + tile size for the streaming MSE reduction."""
    if total_elems % 512 == 0:
        lane = 512
    elif total_elems % 256 == 0:
        lane = 256
    else:
        lane = 128
    rows = pl.cdiv(total_elems, lane)
    if tile_rows is None:
        # ~2 MiB f32 per tile -> 2 inputs x 2 pipeline buffers = 8 MiB + 2 MiB
        # scratch: safe for v7x (32 MiB scoped / 64 MiB physical VMEM) too.
        tile_rows = (2 * 1024 * 1024) // (lane * 4)
    tile_r = min(int(tile_rows), rows)
    tile_r = max(8, ((tile_r + 7) // 8) * 8)          # multiple of 8 sublanes
    n_tiles = pl.cdiv(rows, tile_r)
    return lane, tile_r, n_tiles


def _as_tiles(a, lane, tile_r, n_tiles):
    """Flatten to 1-D (native dtype), zero-pad tail, reshape lane-dense."""
    flat = a.reshape(-1)
    padded = n_tiles * tile_r * lane
    pad = padded - flat.shape[0]
    if pad:
        flat = jnp.pad(flat, (0, pad))
    return flat.reshape(n_tiles * tile_r, lane)


def vae_loss(y_pred, y, recon_x, x, mu, logvar, k1=0.1, k2=0.1,
             tile_rows=None):
    """Pallas implementation of VAELoss.forward. Returns a scalar float32."""
    assert recon_x.shape == x.shape
    n_elems = 1
    for s in recon_x.shape:
        n_elems *= int(s)

    lane, tile_r, n_tiles = _choose_tiling(n_elems, tile_rows)

    rx2 = _as_tiles(recon_x, lane, tile_r, n_tiles)   # native dtype, no astype
    x2 = _as_tiles(x, lane, tile_r, n_tiles)
    y2 = y.reshape(-1).astype(jnp.int32)              # scalar-prefetch operand
    yp2, mu2, lv2 = y_pred, mu, logvar                # tiny, resident in VMEM

    kernel = functools.partial(_vae_loss_kernel, k1=float(k1), k2=float(k2),
                               n_elems=int(n_elems))

    big_spec = pl.BlockSpec((tile_r, lane), lambda t, y_s: (t, 0))

    def resident(shape):
        return pl.BlockSpec(tuple(shape),
                            lambda t, y_s, _n=len(shape): (0,) * _n)

    grid_spec = pltpu.PrefetchScalarGridSpec(
        num_scalar_prefetch=1,
        grid=(n_tiles,),
        in_specs=[big_spec, big_spec,
                  resident(yp2.shape), resident(mu2.shape),
                  resident(lv2.shape)],
        out_specs=pl.BlockSpec((1, 1), lambda t, y_s: (0, 0),
                               memory_space=pltpu.MemorySpace.SMEM),
        scratch_shapes=[pltpu.VMEM((tile_r, lane), jnp.float32)],
    )

    out = pl.pallas_call(
        kernel,
        out_shape=jax.ShapeDtypeStruct((1, 1), jnp.float32),
        grid_spec=grid_spec,
        compiler_params=pltpu.CompilerParams(
            dimension_semantics=("arbitrary",)),
    )(y2, rx2, x2, yp2, mu2, lv2)
    return out[0, 0]


def vae_loss_ref(y_pred, y, recon_x, x, mu, logvar, k1=0.1, k2=0.1):
    """Pure-JAX reference matching the PyTorch module semantics."""
    rx = recon_x.astype(jnp.float32)
    xx = x.astype(jnp.float32)
    mse = jnp.mean((rx - xx) ** 2)
    mu = mu.astype(jnp.float32)
    lv = logvar.astype(jnp.float32)
    kld = jnp.mean(mu * mu) + jnp.mean(jnp.exp(lv)) - jnp.mean(lv) - 1.0
    nll = -jnp.mean(jnp.take_along_axis(y_pred.astype(jnp.float32),
                                        y[:, None], axis=1))
    return nll + k1 * mse + k2 * kld


if __name__ == "__main__":
    key = jax.random.PRNGKey(0)
    k_logits, k_y, k_rx, k_x, k_mu, k_lv = jax.random.split(key, 6)

    batch, n_classes, latent_dim = 4, 16, 32
    img_shape = (batch, 4, 32, 32)                    # NCHW recon / target

    logits = jax.random.normal(k_logits, (batch, n_classes), dtype=jnp.float32)
    y_pred = jax.nn.log_softmax(logits, axis=-1)      # nll_loss expects log-probs
    y = jax.random.randint(k_y, (batch,), 0, n_classes, dtype=jnp.int32)
    recon_x = jax.random.normal(k_rx, img_shape, dtype=jnp.float32)
    x = jax.random.normal(k_x, img_shape, dtype=jnp.float32)
    mu = jax.random.normal(k_mu, (batch, latent_dim), dtype=jnp.float32)
    logvar = jax.random.normal(k_lv, (batch, latent_dim), dtype=jnp.float32)

    ref = jax.block_until_ready(vae_loss_ref(y_pred, y, recon_x, x, mu, logvar))

    # Default tiling (single tile at these small shapes).
    out1 = jax.block_until_ready(vae_loss(y_pred, y, recon_x, x, mu, logvar))
    # Force a multi-step reduction grid to exercise the pipelined accumulator.
    out2 = jax.block_until_ready(
        vae_loss(y_pred, y, recon_x, x, mu, logvar, tile_rows=8))

    assert jnp.allclose(out1, ref, rtol=1e-5, atol=1e-5), (out1, ref)
    assert jnp.allclose(out2, ref, rtol=1e-5, atol=1e-5), (out2, ref)

    # A shape whose flattened size needs tail padding (2*3*16*16 = 1536).
    img2 = (2, 3, 16, 16)
    rx_b = jax.random.normal(k_rx, img2, dtype=jnp.float32)
    x_b = jax.random.normal(k_x, img2, dtype=jnp.float32)
    ref_b = jax.block_until_ready(vae_loss_ref(y_pred, y, rx_b, x_b, mu, logvar))
    out_b = jax.block_until_ready(vae_loss(y_pred, y, rx_b, x_b, mu, logvar))
    assert jnp.allclose(out_b, ref_b, rtol=1e-5, atol=1e-5), (out_b, ref_b)

    print("KERNEL_OK")
</pallas_src>

<mosaic_0001>
module attributes {stable_mosaic.version = 11 : i64} {
  func.func @_vae_loss_kernel(%arg0: i32, %arg1: memref<4xi32, #tpu.memory_space<smem>>, %arg2: memref<32x512xf32, #tpu.memory_space<vmem>>, %arg3: memref<32x512xf32, #tpu.memory_space<vmem>>, %arg4: memref<4x16xf32, #tpu.memory_space<vmem>>, %arg5: memref<4x32xf32, #tpu.memory_space<vmem>>, %arg6: memref<4x32xf32, #tpu.memory_space<vmem>>, %arg7: memref<1x1xf32, #tpu.memory_space<smem>>, %arg8: memref<32x512xf32, #tpu.memory_space<vmem>>) attributes {dimension_semantics = [#tpu.dimension_semantics<arbitrary>], iteration_bounds = array<i64: 1>, scalar_prefetch = 1 : i64, scratch_operands = 1 : i64, tpu.core_type = #tpu.core_type<tc>, window_params = [{transform_indices = @transform_0, window_bounds = array<i64: 32, 512>}, {transform_indices = @transform_1, window_bounds = array<i64: 32, 512>}, {pipeline_mode = #tpu.pipeline_mode<synchronous>, transform_indices = @transform_2, window_bounds = array<i64: 4, 16>}, {pipeline_mode = #tpu.pipeline_mode<synchronous>, transform_indices = @transform_3, window_bounds = array<i64: 4, 32>}, {pipeline_mode = #tpu.pipeline_mode<synchronous>, transform_indices = @transform_4, window_bounds = array<i64: 4, 32>}, {transform_indices = @transform_5, window_bounds = array<i64: 1, 1>}]} {
    %c0_i32 = arith.constant 0 : i32
    %0 = arith.cmpi eq, %arg0, %c0_i32 : i32
    %1 = arith.extui %0 : i1 to i32
    %c0_i32_0 = arith.constant 0 : i32
    %2 = arith.cmpi ne, %1, %c0_i32_0 : i32
    scf.if %2 {
      %cst = arith.constant 0.000000e+00 : f32
      %13 = vector.broadcast %cst : f32 to vector<32x512xf32>
      %c0_10 = arith.constant 0 : index
      %c0_11 = arith.constant 0 : index
      %14 = vector.load %arg8[%c0_10, %c0_11] : memref<32x512xf32, #tpu.memory_space<vmem>>, vector<32x512xf32>
      tpu.vector_store %arg8[%c0_10, %c0_11], %13 {strides = array<i32>} : memref<32x512xf32, #tpu.memory_space<vmem>>, vector<32x512xf32>,
    } else {
    }
    %c0 = arith.constant 0 : index
    %c0_1 = arith.constant 0 : index
    %3 = vector.load %arg2[%c0, %c0_1] : memref<32x512xf32, #tpu.memory_space<vmem>>, vector<32x512xf32>
    %c0_2 = arith.constant 0 : index
    %c0_3 = arith.constant 0 : index
    %4 = vector.load %arg3[%c0_2, %c0_3] : memref<32x512xf32, #tpu.memory_space<vmem>>, vector<32x512xf32>
    %5 = arith.subf %3, %4 : vector<32x512xf32>
    %c0_4 = arith.constant 0 : index
    %c0_5 = arith.constant 0 : index
    %6 = vector.load %arg8[%c0_4, %c0_5] : memref<32x512xf32, #tpu.memory_space<vmem>>, vector<32x512xf32>
    %7 = arith.mulf %5, %5 : vector<32x512xf32>
    %8 = arith.addf %6, %7 : vector<32x512xf32>
    %c0_6 = arith.constant 0 : index
    %c0_7 = arith.constant 0 : index
    %9 = vector.load %arg8[%c0_6, %c0_7] : memref<32x512xf32, #tpu.memory_space<vmem>>, vector<32x512xf32>
    tpu.vector_store %arg8[%c0_6, %c0_7], %8 {strides = array<i32>} : memref<32x512xf32, #tpu.memory_space<vmem>>, vector<32x512xf32>,
    %c0_i32_8 = arith.constant 0 : i32
    %10 = arith.cmpi eq, %arg0, %c0_i32_8 : i32
    %11 = arith.extui %10 : i1 to i32
    %c0_i32_9 = arith.constant 0 : i32
    %12 = arith.cmpi ne, %11, %c0_i32_9 : i32
    scf.if %12 {
      %c0_10 = arith.constant 0 : index
      %c0_11 = arith.constant 0 : index
      %13 = vector.load %arg8[%c0_10, %c0_11] : memref<32x512xf32, #tpu.memory_space<vmem>>, vector<32x512xf32>
      %14 = vector.shape_cast %13 : vector<32x512xf32> to vector<1x32x512xf32>
      %cst = arith.constant dense<0.000000e+00> : vector<1xf32>
      %15 = vector.multi_reduction <add>, %14, %cst [1, 2] : vector<1x32x512xf32> to vector<1xf32>
      %16 = vector.shape_cast %15 : vector<1xf32> to vector<1x1x1xf32>
      %17 = vector.extract %16[0, 0, 0] : f32 from vector<1x1x1xf32>
      %cst_12 = arith.constant 6.10351563E-5 : f32
      %18 = arith.mulf %17, %cst_12 : f32
      %c0_13 = arith.constant 0 : index
      %c0_14 = arith.constant 0 : index
      %19 = vector.load %arg5[%c0_13, %c0_14] : memref<4x32xf32, #tpu.memory_space<vmem>>, vector<4x32xf32>
      %c0_15 = arith.constant 0 : index
      %c0_16 = arith.constant 0 : index
      %20 = vector.load %arg6[%c0_15, %c0_16] : memref<4x32xf32, #tpu.memory_space<vmem>>, vector<4x32xf32>
      %21 = arith.mulf %19, %19 : vector<4x32xf32>
      %22 = vector.shape_cast %21 : vector<4x32xf32> to vector<1x4x32xf32>
      %cst_17 = arith.constant dense<0.000000e+00> : vector<1xf32>
      %23 = vector.multi_reduction <add>, %22, %cst_17 [1, 2] : vector<1x4x32xf32> to vector<1xf32>
      %24 = vector.shape_cast %23 : vector<1xf32> to vector<1x1x1xf32>
      %25 = vector.extract %24[0, 0, 0] : f32 from vector<1x1x1xf32>
      %cst_18 = arith.constant 1.280000e+02 : f32
      %26 = arith.divf %25, %cst_18 : f32
      %27 = math.exp %20 : vector<4x32xf32>
      %28 = vector.shape_cast %27 : vector<4x32xf32> to vector<1x4x32xf32>
      %cst_19 = arith.constant dense<0.000000e+00> : vector<1xf32>
      %29 = vector.multi_reduction <add>, %28, %cst_19 [1, 2] : vector<1x4x32xf32> to vector<1xf32>
      %30 = vector.shape_cast %29 : vector<1xf32> to vector<1x1x1xf32>
      %31 = vector.extract %30[0, 0, 0] : f32 from vector<1x1x1xf32>
      %cst_20 = arith.constant 1.280000e+02 : f32
      %32 = arith.divf %31, %cst_20 : f32
      %33 = arith.addf %26, %32 : f32
      %34 = vector.shape_cast %20 : vector<4x32xf32> to vector<1x4x32xf32>
      %cst_21 = arith.constant dense<0.000000e+00> : vector<1xf32>
      %35 = vector.multi_reduction <add>, %34, %cst_21 [1, 2] : vector<1x4x32xf32> to vector<1xf32>
      %36 = vector.shape_cast %35 : vector<1xf32> to vector<1x1x1xf32>
      %37 = vector.extract %36[0, 0, 0] : f32 from vector<1x1x1xf32>
      %cst_22 = arith.constant 1.280000e+02 : f32
      %38 = arith.divf %37, %cst_22 : f32
      %39 = arith.subf %33, %38 : f32
      %cst_23 = arith.constant 1.000000e+00 : f32
      %40 = arith.subf %39, %cst_23 : f32
      %c0_24 = arith.constant 0 : index
      %c0_25 = arith.constant 0 : index
      %41 = vector.load %arg4[%c0_24, %c0_25] : memref<4x16xf32, #tpu.memory_space<vmem>>, vector<4x16xf32>
      %42 = tpu.iota {dimensions = array<i32: 1>} : vector<1x16xi32>
      %c0_26 = arith.constant 0 : index
      %43 = memref.load %arg1[%c0_26] : memref<4xi32, #tpu.memory_space<smem>>
      %44 = vector.broadcast %43 : i32 to vector<1x16xi32>
      %45 = arith.cmpi eq, %42, %44 : vector<1x16xi32>
      %46 = vector.extract_strided_slice %41 {offsets = [0, 0], sizes = [1, 16], strides = [1, 1]} : vector<4x16xf32> to vector<1x16xf32>
      %47 = vector.shape_cast %46 : vector<1x16xf32> to vector<16xf32>
      %cst_27 = arith.constant 0.000000e+00 : f32
      %48 = vector.shape_cast %47 : vector<16xf32> to vector<1x16xf32>
      %49 = vector.broadcast %cst_27 : f32 to vector<1x16xf32>
      %50 = arith.select %45, %48, %49 : vector<1x16xi1>, vector<1x16xf32>
      %51 = vector.shape_cast %50 : vector<1x16xf32> to vector<1x1x16xf32>
      %cst_28 = arith.constant dense<0.000000e+00> : vector<1xf32>
      %52 = vector.multi_reduction <add>, %51, %cst_28 [1, 2] : vector<1x1x16xf32> to vector<1xf32>
      %53 = vector.shape_cast %52 : vector<1xf32> to vector<1x1x1xf32>
      %54 = vector.extract %53[0, 0, 0] : f32 from vector<1x1x1xf32>
      %cst_29 = arith.constant 0.000000e+00 : f32
      %55 = arith.addf %cst_29, %54 : f32
      %c1 = arith.constant 1 : index
      %56 = memref.load %arg1[%c1] : memref<4xi32, #tpu.memory_space<smem>>
      %57 = vector.broadcast %56 : i32 to vector<1x16xi32>
      %58 = arith.cmpi eq, %42, %57 : vector<1x16xi32>
      %59 = vector.extract_strided_slice %41 {offsets = [1, 0], sizes = [1, 16], strides = [1, 1]} : vector<4x16xf32> to vector<1x16xf32>
      %60 = vector.shape_cast %59 : vector<1x16xf32> to vector<16xf32>
      %cst_30 = arith.constant 0.000000e+00 : f32
      %61 = vector.shape_cast %60 : vector<16xf32> to vector<1x16xf32>
      %62 = vector.broadcast %cst_30 : f32 to vector<1x16xf32>
      %63 = arith.select %58, %61, %62 : vector<1x16xi1>, vector<1x16xf32>
      %64 = vector.shape_cast %63 : vector<1x16xf32> to vector<1x1x16xf32>
      %cst_31 = arith.constant dense<0.000000e+00> : vector<1xf32>
      %65 = vector.multi_reduction <add>, %64, %cst_31 [1, 2] : vector<1x1x16xf32> to vector<1xf32>
      %66 = vector.shape_cast %65 : vector<1xf32> to vector<1x1x1xf32>
      %67 = vector.extract %66[0, 0, 0] : f32 from vector<1x1x1xf32>
      %68 = arith.addf %55, %67 : f32
      %c2 = arith.constant 2 : index
      %69 = memref.load %arg1[%c2] : memref<4xi32, #tpu.memory_space<smem>>
      %70 = vector.broadcast %69 : i32 to vector<1x16xi32>
      %71 = arith.cmpi eq, %42, %70 : vector<1x16xi32>
      %72 = vector.extract_strided_slice %41 {offsets = [2, 0], sizes = [1, 16], strides = [1, 1]} : vector<4x16xf32> to vector<1x16xf32>
      %73 = vector.shape_cast %72 : vector<1x16xf32> to vector<16xf32>
      %cst_32 = arith.constant 0.000000e+00 : f32
      %74 = vector.shape_cast %73 : vector<16xf32> to vector<1x16xf32>
      %75 = vector.broadcast %cst_32 : f32 to vector<1x16xf32>
      %76 = arith.select %71, %74, %75 : vector<1x16xi1>, vector<1x16xf32>
      %77 = vector.shape_cast %76 : vector<1x16xf32> to vector<1x1x16xf32>
      %cst_33 = arith.constant dense<0.000000e+00> : vector<1xf32>
      %78 = vector.multi_reduction <add>, %77, %cst_33 [1, 2] : vector<1x1x16xf32> to vector<1xf32>
      %79 = vector.shape_cast %78 : vector<1xf32> to vector<1x1x1xf32>
      %80 = vector.extract %79[0, 0, 0] : f32 from vector<1x1x1xf32>
      %81 = arith.addf %68, %80 : f32
      %c3 = arith.constant 3 : index
      %82 = memref.load %arg1[%c3] : memref<4xi32, #tpu.memory_space<smem>>
      %83 = vector.broadcast %82 : i32 to vector<1x16xi32>
      %84 = arith.cmpi eq, %42, %83 : vector<1x16xi32>
      %85 = vector.extract_strided_slice %41 {offsets = [3, 0], sizes = [1, 16], strides = [1, 1]} : vector<4x16xf32> to vector<1x16xf32>
      %86 = vector.shape_cast %85 : vector<1x16xf32> to vector<16xf32>
      %cst_34 = arith.constant 0.000000e+00 : f32
      %87 = vector.shape_cast %86 : vector<16xf32> to vector<1x16xf32>
      %88 = vector.broadcast %cst_34 : f32 to vector<1x16xf32>
      %89 = arith.select %84, %87, %88 : vector<1x16xi1>, vector<1x16xf32>
      %90 = vector.shape_cast %89 : vector<1x16xf32> to vector<1x1x16xf32>
      %cst_35 = arith.constant dense<0.000000e+00> : vector<1xf32>
      %91 = vector.multi_reduction <add>, %90, %cst_35 [1, 2] : vector<1x1x16xf32> to vector<1xf32>
      %92 = vector.shape_cast %91 : vector<1xf32> to vector<1x1x1xf32>
      %93 = vector.extract %92[0, 0, 0] : f32 from vector<1x1x1xf32>
      %94 = arith.addf %81, %93 : f32
      %cst_36 = arith.constant 0.000000e+00 : f32
      %95 = arith.subf %cst_36, %94 : f32
      %cst_37 = arith.constant 2.500000e-01 : f32
      %96 = arith.mulf %95, %cst_37 : f32
      %cst_38 = arith.constant 1.000000e-01 : f32
      %97 = arith.mulf %cst_38, %18 : f32
      %98 = arith.addf %96, %97 : f32
      %cst_39 = arith.constant 1.000000e-01 : f32
      %99 = arith.mulf %cst_39, %40 : f32
      %100 = arith.addf %98, %99 : f32
      %c0_40 = arith.constant 0 : index
      %c0_41 = arith.constant 0 : index
      %101 = memref.load %arg7[%c0_40, %c0_41] : memref<1x1xf32, #tpu.memory_space<smem>>
      memref.store %100, %arg7[%c0_40, %c0_41] : memref<1x1xf32, #tpu.memory_space<smem>>
    } else {
    }
    return
  }
  func.func @transform_0(%arg0: i32, %arg1: memref<4xi32, #tpu.memory_space<smem>>) -> (i32, i32) {
    %c0_i32 = arith.constant 0 : i32
    %c0_i32_0 = arith.constant 0 : i32
    return %arg0, %c0_i32 : i32, i32
  }
  func.func @transform_1(%arg0: i32, %arg1: memref<4xi32, #tpu.memory_space<smem>>) -> (i32, i32) {
    %c0_i32 = arith.constant 0 : i32
    %c0_i32_0 = arith.constant 0 : i32
    return %arg0, %c0_i32 : i32, i32
  }
  func.func @transform_2(%arg0: i32, %arg1: memref<4xi32, #tpu.memory_space<smem>>) -> (i32, i32) {
    %c0_i32 = arith.constant 0 : i32
    %c0_i32_0 = arith.constant 0 : i32
    %c0_i32_1 = arith.constant 0 : i32
    return %c0_i32, %c0_i32_0 : i32, i32
  }
  func.func @transform_3(%arg0: i32, %arg1: memref<4xi32, #tpu.memory_space<smem>>) -> (i32, i32) {
    %c0_i32 = arith.constant 0 : i32
    %c0_i32_0 = arith.constant 0 : i32
    %c0_i32_1 = arith.constant 0 : i32
    return %c0_i32, %c0_i32_0 : i32, i32
  }
  func.func @transform_4(%arg0: i32, %arg1: memref<4xi32, #tpu.memory_space<smem>>) -> (i32, i32) {
    %c0_i32 = arith.constant 0 : i32
    %c0_i32_0 = arith.constant 0 : i32
    %c0_i32_1 = arith.constant 0 : i32
    return %c0_i32, %c0_i32_0 : i32, i32
  }
  func.func @transform_5(%arg0: i32, %arg1: memref<4xi32, #tpu.memory_space<smem>>) -> (i32, i32) {
    %c0_i32 = arith.constant 0 : i32
    %c0_i32_0 = arith.constant 0 : i32
    %c0_i32_1 = arith.constant 0 : i32
    return %c0_i32, %c0_i32_0 : i32, i32
  }
}

</mosaic_0001>

<bundles_post_ra>
// kernel: tpu_custom_call.1
= control target key start
LH: loop header
LB: loop body
LE: loop exit
PB: predicated region body
PF: predicated region fallthrough
CT: control target
= control target key end

     0   :  { %s595_s24 = smov [#allocation4]   ;;  %s679_s0 = inlined_call_operand.hbm [shape: s32[4], index: 0, kind: input, shape index: {}]   ;;  %s680_s1 = inlined_call_operand.hbm [shape: f32[32,512], index: 1, kind: input, shape index: {}]   ;;  %s681_s2 = inlined_call_operand.hbm [shape: f32[32,512], index: 2, kind: input, shape index: {}]   ;;  %s682_s3 = inlined_call_operand.hbm [shape: f32[4,16], index: 3, kind: input, shape index: {}]   ;;  %s683_s4 = inlined_call_operand.hbm [shape: f32[4,32], index: 4, kind: input, shape index: {}]   ;;  %s684_s5 = inlined_call_operand.vmem [shape: f32[4,32], index: 5, kind: input, shape index: {}]   ;;  %s685_s6 = inlined_call_operand.hbm [shape: f32[1,1], index: 6, kind: output, shape index: {}]  }
   0x1   :  { %s12_s23 = sshll.u32 %s679_s0, 4  ;;  %s13_s23 = int_to_ptr.hbm [resolvable:$true] %s12_s23 }
   0x2   :  { %15 = dma.hbm_to_smem %s13_s23, 16, %s595_s24, [#allocation3] }
   0x3   :  { %585 = dma.done.wait [#allocation3], 16 }
   0x4   :  { %586 = vsyncadd [#allocation3], 4294967280 }
   0x5   :  { %18 = sfence }
   0x6   :  { %19 = vsyncpa [#allocation6], 0 }
   0x7   :  { %20 = vsyncpa [#allocation9], 0 }
   0x8   :  { %21 = vsyncpa [#allocation12], 0 }
   0x9   :  { %22 = vsyncpa [#allocation7], 0  ;;  %s40_s27 = sshll.u32 %s681_s2, 4  ;;  %s596_s28 = smov [#allocation8]   ;;  %s41_s27 = int_to_ptr.hbm [resolvable:$true] %s40_s27 }
   0xa   :  { %s42_s29 = sshll.u32 %s596_s28, 4  ;;  %s27_s7 = sshll.u32 %s680_s1, 4  ;;  %s43_s29 = int_to_ptr.vmem [resolvable:$true] %s42_s29  ;;  %s28_s7 = int_to_ptr.hbm [resolvable:$true] %s27_s7 }
   0xb   :  { %s597_s8 = smov 512   ;;  %s598_s9 = smov 32  }
   0xc   :  { %48 = dma.hbm_to_vmem [thread:$0]  %s41_s27, 2048, %s43_s29, [#allocation9], %s597_s8, %s597_s8, %s598_s9  }
   0xd   :  { %s599_s10 = smov [#allocation5]   ;;  %s54_s14 = sshll.u32 %s682_s3, 4  ;;  %s55_s14 = int_to_ptr.hbm [resolvable:$true] %s54_s14 }
   0xe   :  { %s29_s11 = sshll.u32 %s599_s10, 4  ;;  %s65_s16 = sshll.u32 %s683_s4, 4  ;;  %s30_s11 = int_to_ptr.vmem [resolvable:$true] %s29_s11  ;;  %s66_s16 = int_to_ptr.hbm [resolvable:$true] %s65_s16 }
   0xf   :  { %35 = dma.hbm_to_vmem [thread:$0]  %s28_s7, 2048, %s30_s11, [#allocation6], %s597_s8, %s597_s8, %s598_s9  }
  0x10   :  { %s600_s17 = smov [#allocation10]   ;;  %s601_s1 = smov [#allocation11]  }
  0x11   :  { %s56_s18 = sshll.u32 %s600_s17, 4  ;;  %s67_s19 = sshll.u32 %s601_s1, 4  ;;  %s57_s18 = int_to_ptr.vmem [resolvable:$true] %s56_s18  ;;  %s68_s19 = int_to_ptr.vmem [resolvable:$true] %s67_s19 }
  0x12   :  { %59 = dma.hbm_to_vmem [thread:$0]  %s55_s14, 64, %s57_s18, [#allocation9]  }
  0x13   :  { %70 = dma.hbm_to_vmem [thread:$0]  %s66_s16, 64, %s68_s19, [#allocation12]  }
  0x14   :  { %587 = dma.done.wait [#allocation6], 2048  }
  0x15   :  { %588 = vsyncadd [#allocation6], 4294965248 }
  0x16   :  { %589 = dma.done.wait [#allocation9], 2112  }
  0x17   :  { %590 = vsyncadd [#allocation9], 4294965184 }
  0x18   :  { %591 = dma.done.wait [#allocation12], 64  }
  0x19   :  { %592 = vsyncadd [#allocation12], 4294967232  ;;  %v332_v0 = vlaneseq  ;;  %s334_s3 = sld [smem:[#allocation4]]  ;;  %vm268_vm0 = vcmask 257024   ;;  %vm338_vm1 = vcmask 122880   ;;  %v109_v15 = vld [vmem:[#allocation5] sm:$0xff] }
  0x1a   :  { %s431_s20 = sld [smem:[#allocation4 + $0x1]]  ;;  %v265_v2 = vld [vmem:[#allocation11] sm:$0xf]  ;;  %v266_v3 = vld [vmem:[%s684_s5] sm:$0xf]  ;;  %v110_v16 = vld [vmem:[#allocation5 + $0x8] sm:$0xff] }
  0x1b   :  { %v654_v1 = vand.u32 127, %v332_v0  ;;  %v659_v4 = vld [vmem:[#allocation10] sm:$0xf]  ;;  %v267_v6 = vmul.f32 %v265_v2, %v265_v2  ;;  %v310_v7 = vsel %vm268_vm0, %v266_v3, 0.0  ;;  %v288_v8 = vmul.f32 1.442695, %v266_v3 }
  0x1c   :  { %311 = vadd.xlane.f32.xlu1 %v310_v7  ;;  %v125_v17 = vld [vmem:[#allocation8] sm:$0xff]  ;;  %v126_v18 = vld [vmem:[#allocation8 + $0x8] sm:$0xff]  ;;  %v111_v19 = vld [vmem:[#allocation5 + $0x10] sm:$0xff]  ;;  %s433_s5 = sld [smem:[#allocation4 + $0x3]] }
  0x1d   :  { %v269_v11 = vsel %vm268_vm0, %v267_v6, 0.0  ;;  %461 = vpow2.f32 %v288_v8  ;;  %v127_v20 = vld [vmem:[#allocation8 + $0x10] sm:$0xff]  ;;  %v141_v21 = vsub.f32 %v109_v15, %v125_v17  ;;  %v142_v22 = vsub.f32 %v110_v16, %v126_v18  ;;  %v112_v25 = vld [vmem:[#allocation5 + $0x18] sm:$0xff]  ;;  %v113_v29 = vld [vmem:[#allocation5 + $0x20] sm:$0xff]  ;;  %s432_s22 = sld [smem:[#allocation4 + $0x2]] }
  0x1e   :  { %270 = vadd.xlane.f32.xlu0 %v269_v11  ;;  %v128_v26 = vld [vmem:[#allocation8 + $0x18] sm:$0xff]  ;;  %v143_v28 = vsub.f32 %v111_v19, %v127_v20  ;;  %v129_v30 = vld [vmem:[#allocation8 + $0x20] sm:$0xff]  ;;  %v114_v34 = vld [vmem:[#allocation5 + $0x28] sm:$0xff] }
  0x1f   :  { %v335_v5 = vstv %s334_s3  ;;  %v144_v31 = vsub.f32 %v112_v25, %v128_v26  ;;  %v173_v32 = vmul.f32 %v141_v21, %v141_v21  ;;  %v174_v33 = vmul.f32 %v142_v22, %v142_v22  ;;  %v130_v35 = vld [vmem:[#allocation8 + $0x28] sm:$0xff]  ;;  %v115_v38 = vld [vmem:[#allocation5 + $0x30] sm:$0xff]  ;;  %v116_v44 = vld [vmem:[#allocation5 + $0x38] sm:$0xff]  ;;  %s417_s3 = sshll.u32 %s685_s6, 4  ;;  %s418_s3 = int_to_ptr.hbm [resolvable:$true] %s417_s3 }
  0x20   :  { %vm336_vm2 = vcmp.eq.s32.totalorder %v654_v1, %v335_v5  ;;  %v351_v10 = vstv %s431_s20  ;;  %v145_v36 = vsub.f32 %v113_v29, %v129_v30  ;;  %v175_v37 = vmul.f32 %v143_v28, %v143_v28  ;;  %v131_v39 = vld [vmem:[#allocation8 + $0x30] sm:$0xff]  ;;  %v132_v45 = vld [vmem:[#allocation8 + $0x38] sm:$0xff]  ;;  %v117_v50 = vld [vmem:[#allocation5 + $0x40] sm:$0xff] }
  0x21   :  { %v337_v9 = vsel %vm336_vm2, %v659_v4, 0.0  ;;  %vm352_vm3 = vcmp.eq.s32.totalorder %v654_v1, %v351_v10  ;;  %v146_v40 = vsub.f32 %v114_v34, %v130_v35  ;;  %v176_v41 = vmul.f32 %v144_v31, %v144_v31  ;;  %v133_v51 = vld [vmem:[#allocation8 + $0x40] sm:$0xff]  ;;  %v118_v56 = vld [vmem:[#allocation5 + $0x48] sm:$0xff]  ;;  %v119_v62 = vld [vmem:[#allocation5 + $0x50] sm:$0xff] }
  0x22   :  { %v339_v12 = vsel %vm338_vm1, %v337_v9, 0.0  ;;  %v353_v13 = vsel %vm352_vm3, %v659_v4, 0.0  ;;  %v240_v42 = vadd.f32 %v174_v33, %v173_v32  ;;  %v387_v43 = vstv %s433_s5  ;;  %v134_v57 = vld [vmem:[#allocation8 + $0x48] sm:$0xff]  ;;  %v135_v63 = vld [vmem:[#allocation8 + $0x50] sm:$0xff]  ;;  %v120_v5 = vld [vmem:[#allocation5 + $0x58] sm:$0xff]  ;;  %s603_s5 = smov [#allocation13]  }
  0x23   :  { %340 = vadd.xlane.f32.xlu2 %v339_v12  ;;  %v355_v14 = vrot.slane %v353_v13, 1  ;;  %v462_v23 = vpop.eup %461  ;;  %vm388_vm4 = vcmp.eq.s32.totalorder %v654_v1, %v387_v43  ;;  %v147_v46 = vsub.f32 %v115_v38, %v131_v39  ;;  %v177_v47 = vmul.f32 %v145_v36, %v145_v36  ;;  %v136_v6 = vld [vmem:[#allocation8 + $0x58] sm:$0xff]  ;;  %v121_v10 = vld [vmem:[#allocation5 + $0x60] sm:$0xff]  ;;  %v122_v15 = vld [vmem:[#allocation5 + $0x68] sm:$0xff] }
  0x24   :  { %v290_v27 = vsel %vm268_vm0, %v462_v23, 0.0  ;;  %v241_v48 = vadd.f32 %v240_v42, %v175_v37  ;;  %v389_v49 = vsel %vm388_vm4, %v659_v4, 0.0  ;;  %v148_v53 = vsub.f32 %v116_v44, %v132_v45  ;;  %v137_v11 = vld [vmem:[#allocation8 + $0x60] sm:$0xff]  ;;  %v138_v16 = vld [vmem:[#allocation8 + $0x68] sm:$0xff]  ;;  %v123_v20 = vld [vmem:[#allocation5 + $0x70] sm:$0xff] }
  0x25   :  { %v357_v24 = vsel %vm338_vm1, %v355_v14, 0.0  ;;  %291 = vadd.xlane.f32.xlu1 %v290_v27  ;;  %v391_v52 = vrot.slane %v389_v49, 3  ;;  %v178_v54 = vmul.f32 %v146_v40, %v146_v40  ;;  %v149_v59 = vsub.f32 %v117_v50, %v133_v51  ;;  %v139_v21 = vld [vmem:[#allocation8 + $0x70] sm:$0xff]  ;;  %v124_v25 = vld [vmem:[#allocation5 + $0x78] sm:$0xff] }
  0x26   :  { %v242_v55 = vadd.f32 %v241_v48, %v176_v41  ;;  %v179_v60 = vmul.f32 %v147_v46, %v147_v46  ;;  %v150_v0 = vsub.f32 %v118_v56, %v134_v57  ;;  %v180_v2 = vmul.f32 %v148_v53, %v148_v53  ;;  %v140_v26 = vld [vmem:[#allocation8 + $0x78] sm:$0xff] }
  0x27   :  { %v393_v58 = vsel %vm338_vm1, %v391_v52, 0.0  ;;  %v151_v7 = vsub.f32 %v119_v62, %v135_v63  ;;  %v181_v8 = vmul.f32 %v149_v59, %v149_v59  ;;  %v152_v12 = vsub.f32 %v120_v5, %v136_v6 }
  0x28   :  { %v243_v61 = vadd.f32 %v242_v55, %v177_v47  ;;  %v182_v13 = vmul.f32 %v150_v0, %v150_v0  ;;  %v153_v17 = vsub.f32 %v121_v10, %v137_v11  ;;  %v154_v22 = vsub.f32 %v122_v15, %v138_v16 }
  0x29   :  { %v183_v18 = vmul.f32 %v151_v7, %v151_v7  ;;  %v184_v23 = vmul.f32 %v152_v12, %v152_v12  ;;  %v155_v27 = vsub.f32 %v123_v20, %v139_v21  ;;  %v156_v30 = vsub.f32 %v124_v25, %v140_v26 }
  0x2a   :  { %v244_v3 = vadd.f32 %v243_v61, %v178_v54  ;;  %v185_v28 = vmul.f32 %v153_v17, %v153_v17  ;;  %v186_v31 = vmul.f32 %v154_v22, %v154_v22  ;;  %v369_v35 = vstv %s432_s22 }
  0x2b   :  { %358 = vadd.xlane.f32.xlu2 %v357_v24  ;;  %v187_v33 = vmul.f32 %v155_v27, %v155_v27  ;;  %v188_v36 = vmul.f32 %v156_v30, %v156_v30  ;;  %vm370_vm5 = vcmp.eq.s32.totalorder %v654_v1, %v369_v35  ;;  %v602_v46 = vmov 128.0  }
  0x2c   :  { %v245_v9 = vadd.f32 %v244_v3, %v179_v60  ;;  %v371_v40 = vsel %vm370_vm5, %v659_v4, 0.0  ;;  %463 = vrcp.f32 %v602_v46 }
  0x2d   :  { %394 = vadd.xlane.f32.xlu1 %v393_v58  ;;  %v373_v41 = vrot.slane %v371_v40, 2 }
  0x2e   :  { %v246_v14 = vadd.f32 %v245_v9, %v180_v2 }
  0x2f   :  { %v375_v42 = vsel %vm338_vm1, %v373_v41, 0.0 }
  0x30   :  { %v247_v19 = vadd.f32 %v246_v14, %v181_v8 }
  0x32   :  { %v248_v24 = vadd.f32 %v247_v19, %v182_v13  ;;  %v464_v50 = vpop.eup %463 }
  0x33   :  { %v280_v4 = vmul.f32 128.0, %v464_v50  ;;  %vm284_vm6 = vweird.f32 %v464_v50 }
  0x34   :  { %v249_v29 = vadd.f32 %v248_v24, %v183_v18 }
  0x35   :  { %v281_v63 = vsub.f32 1.0, %v280_v4 }
  0x36   :  { %v250_v32 = vadd.f32 %v249_v29, %v184_v23 }
  0x37   :  { %v282_v10 = vmul.f32 %v464_v50, %v281_v63 }
  0x38   :  { %v251_v34 = vadd.f32 %v250_v32, %v185_v28 }
  0x39   :  { %v283_v19 = vadd.f32 %v464_v50, %v282_v10 }
  0x3a   :  { %v252_v37 = vadd.f32 %v251_v34, %v186_v31 }
  0x3b   :  { %v285_v30 = vsel %vm284_vm6, %v464_v50, %v283_v19 }
  0x3c   :  { %v253_v38 = vadd.f32 %v252_v37, %v187_v33 }
  0x3e   :  { %v254_v39 = vadd.f32 %v253_v38, %v188_v36 }
  0x40   :  { %255 = vadd.xlane.f32.xlu0 %v254_v39 }
  0x48   :  { %376 = vadd.xlane.f32.xlu0 %v375_v42 }
  0x8f   :  { %v312_v43 = vpop.xlane.xlu1 %311 }
  0x90   :  { %v313_v1 = vrot.slane %v312_v43, 4 }
  0x91   :  { %v271_v47 = vpop.xlane.xlu0 %270 }
  0x92   :  { %v272_v48 = vrot.slane %v271_v47, 4  ;;  %v314_v57 = vadd.f32 %v313_v1, %v312_v43 }
  0x94   :  { %v273_v53 = vadd.f32 %v272_v48, %v271_v47  ;;  %v315_v3 = vrot.slane %v314_v57, 2 }
  0x96   :  { %v341_v44 = vpop.xlane.xlu2 %340  ;;  %v274_v59 = vrot.slane %v273_v53, 2  ;;  %v316_v15 = vadd.f32 %v315_v3, %v314_v57 }
  0x97   :  { %v342_v54 = vrot.slane %v341_v44, 4 }
  0x98   :  { %v292_v45 = vpop.xlane.xlu1 %291  ;;  %v275_v9 = vadd.f32 %v274_v59, %v273_v53  ;;  %v317_v26 = vrot.slane %v316_v15, 1 }
  0x99   :  { %v293_v51 = vrot.slane %v292_v45, 4  ;;  %v343_v60 = vadd.f32 %v342_v54, %v341_v44 }
  0x9a   :  { %v276_v18 = vrot.slane %v275_v9, 1  ;;  %v318_v35 = vadd.f32 %v317_v26, %v316_v15 }
  0x9b   :  { %v294_v56 = vadd.f32 %v293_v51, %v292_v45  ;;  %v344_v7 = vrot.slane %v343_v60, 2 }
  0x9c   :  { %v277_v29 = vadd.f32 %v276_v18, %v275_v9 }
  0x9d   :  { %v295_v2 = vrot.slane %v294_v56, 2  ;;  %v345_v20 = vadd.f32 %v344_v7, %v343_v60 }
  0x9e   :  { %v359_v49 = vpop.xlane.xlu2 %358 }
  0x9f   :  { %v360_v52 = vrot.slane %v359_v49, 4  ;;  %v296_v12 = vadd.f32 %v295_v2, %v294_v56  ;;  %v346_v31 = vrot.slane %v345_v20, 1 }
  0xa0   :  { %v395_v55 = vpop.xlane.xlu1 %394 }
  0xa1   :  { %v361_v58 = vadd.f32 %v360_v52, %v359_v49  ;;  %v396_v62 = vrot.slane %v395_v55, 4  ;;  %v297_v23 = vrot.slane %v296_v12, 1  ;;  %v347_v37 = vadd.f32 %v346_v31, %v345_v20 }
  0xa3   :  { %v362_v5 = vrot.slane %v361_v58, 2  ;;  %v397_v8 = vadd.f32 %v396_v62, %v395_v55  ;;  %v298_v33 = vadd.f32 %v297_v23, %v296_v12 }
  0xa5   :  { %v363_v13 = vadd.f32 %v362_v5, %v361_v58  ;;  %v398_v16 = vrot.slane %v397_v8, 2 }
  0xa7   :  { %v364_v27 = vrot.slane %v363_v13, 1  ;;  %v399_v28 = vadd.f32 %v398_v16, %v397_v8 }
  0xa9   :  { %v365_v36 = vadd.f32 %v364_v27, %v363_v13  ;;  %v400_v38 = vrot.slane %v399_v28, 1 }
  0xab   :  { %v401_v41 = vadd.f32 %v400_v38, %v399_v28 }
  0xb3   :  { %v256_v61 = vpop.xlane.xlu0 %255 }
  0xb4   :  { %v257_v0 = vrot.slane %v256_v61, 4 }
  0xb6   :  { %v258_v6 = vadd.f32 %v257_v0, %v256_v61 }
  0xb8   :  { %v259_v11 = vrot.slane %v258_v6, 2 }
  0xba   :  { %v260_v14 = vadd.f32 %v259_v11, %v258_v6 }
  0xbb   :  { %v377_v17 = vpop.xlane.xlu0 %376 }
  0xbc   :  { %v378_v21 = vrot.slane %v377_v17, 4  ;;  %v261_v22 = vrot.slane %v260_v14, 1 }
  0xbe   :  { %v379_v24 = vadd.f32 %v378_v21, %v377_v17  ;;  %v262_v25 = vadd.f32 %v261_v22, %v260_v14 }
  0xc0   :  { %v380_v32 = vrot.slane %v379_v24, 2  ;;  %434 = vpush %v262_v25 }
  0xc1   :  { %436 = vpush %v277_v29 }
  0xc2   :  { %v381_v34 = vadd.f32 %v380_v32, %v379_v24  ;;  %438 = vpush %v285_v30 }
  0xc3   :  { %440 = vpush %v298_v33 }
  0xc4   :  { %442 = vpush %v318_v35  ;;  %v382_v39 = vrot.slane %v381_v34, 1 }
  0xc5   :  { %444 = vpush %v347_v37 }
  0xc6   :  { %446 = vpush %v365_v36  ;;  %v383_v40 = vadd.f32 %v382_v39, %v381_v34 }
  0xc8   :  { %448 = vpush %v383_v40 }
  0xc9   :  { %450 = vpush %v401_v41 }
  0xf1   :  { %s435_s23 = spop %434 }
  0xf2   :  { %s437_s24 = spop %436  ;;  %s264_s13 = smul.f32 6.1035156e-05, %s435_s23 }
  0xf3   :  { %s439_s25 = spop %438 }
  0xf4   :  { %s441_s26 = spop %440  ;;  %s287_s27 = smul.f32 %s439_s25, %s437_s24 }
  0xf5   :  { %s443_s28 = spop %442  ;;  %s308_s29 = smul.f32 %s441_s26, %s439_s25 }
  0xf6   :  { %s445_s30 = spop %444  ;;  %s328_s8 = smul.f32 %s443_s28, %s439_s25 }
  0xf7   :  { %s447_s0 = spop %446  ;;  %s309_s7 = sadd.f32 %s308_s29, %s287_s27 }
  0xf8   :  { %s367_s9 = sadd.f32 %s447_s0, %s445_s30  ;;  %s406_s17 = smul.f32 0.1, %s264_s13 }
  0xf9   :  { %s449_s10 = spop %448  ;;  %s329_s11 = ssub.f32 %s309_s7, %s328_s8 }
  0xfa   :  { %s385_s12 = sadd.f32 %s449_s10, %s367_s9  ;;  %s451_s14 = spop %450 }
  0xfb   :  { %s430_s15 = sadd.f32 -1.0, %s329_s11 }
  0xfc   :  { %s403_s2 = sadd.f32 %s451_s14, %s385_s12 }
  0xfd   :  { %s408_s20 = smul.f32 0.1, %s430_s15 }
  0xfe   :  { %s404_s16 = ssub.f32 0.0, %s403_s2 }
 0x100   :  { %s405_s18 = smul.f32 0.25, %s404_s16 }
 0x102   :  { %s407_s4 = sadd.f32 %s406_s17, %s405_s18 }
 0x104   :  { %s409_s21 = sadd.f32 %s408_s20, %s407_s4 }
 0x106   :  { %411 = sst [smem:[#allocation13]] %s409_s21 }
 0x107   :  { %420 = dma.smem_to_hbm %s603_s5, 16, %s418_s3, [#allocation7]  }
 0x108   :  { %593 = dma.done.wait [#allocation7], 16  }
 0x109   :  { %594 = vsyncadd [#allocation7], 4294967280 }
 0x10a   :  { %425 = sfence }
 0x10b   :  { %426 = vsyncpa [#allocation6], 1 }
 0x10c   :  { %427 = vsyncpa [#allocation9], 1 }
 0x10d   :  { %428 = vsyncpa [#allocation12], 1 }
 0x10e   :  { %429 = vsyncpa [#allocation7], 1 }

</bundles_post_ra>
